<compile_context>
chip_gen: v5e
topology: v5e:2x2
jax: 0.10.0
libtpu: 0.0.40
codegen_flags: <defaults>
</compile_context>

<pallas_src>
import functools

import jax
import jax.numpy as jnp
from jax.experimental import pallas as pl
from jax.experimental.pallas import tpu as pltpu


# ----------------------------------------------------------------------------
# Fused kernel: encoder forward + manifold_norm + manifold_eikonal (+ geodesic)
# ----------------------------------------------------------------------------
def _make_fused_loss_kernel(n_nodes, n_dim, n_hidden, n_out, compute_geodesic):
    """All shape parameters are static Python ints; compute_geodesic is static."""

    def kernel(scal_ref, coords_t_ref, w1b1_ref, w2b2_ref, *rest):
        if compute_geodesic:
            bd_ref, out_ref = rest
        else:
            (out_ref,) = rest

        coords_t = coords_t_ref[...]                     # (D, N)   lane axis = nodes
        w1b1 = w1b1_ref[...]                             # (H, D+1) = [W1^T | b1^T]
        w2b2 = w2b2_ref[...]                             # (C, H+1) = [W2^T | b2^T]
        w2_t = w2b2[:, :n_hidden]                        # (C, H)
        b2_t = w2b2[:, n_hidden:n_hidden + 1]            # (C, 1)

        # z^T = W1^T x^T + b1^T, done as D broadcast multiply-adds on the VPU
        # (a K=3 contraction would push nearly-empty passes through the MXU).
        z = jnp.broadcast_to(w1b1[:, n_dim:n_dim + 1], (n_hidden, n_nodes))
        for d in range(n_dim):                            # static D
            z = z + w1b1[:, d:d + 1] * coords_t[d:d + 1, :]
        a = jnp.tanh(z)                                                       # (H, N)
        out_t = jnp.dot(w2_t, a, preferred_element_type=jnp.float32) + b2_t   # (C, N)

        # losses['manifold_norm'] = vector_norm(out, dim=-1, ord=1).mean()
        norm_loss = jnp.sum(jnp.abs(out_t), keepdims=True) / n_nodes          # (1, 1)

        # gradients_pc(out, coords): grads[n, c, d] = d out[n,c] / d coords[n,d]
        #   = sum_h (1 - tanh^2(z[n,h])) * W1[d,h] * W2[h,c]
        # Computed per coordinate by scaling s's rows with W1[d,:], then one
        # K=32 MXU matmul against W2^T; squares accumulated over d.
        s = 1.0 - a * a                                                       # (H, N)
        gsq = jnp.zeros((n_out, n_nodes), jnp.float32)
        for d in range(n_dim):                            # static D
            s_d = s * w1b1[:, d:d + 1]                                        # (H, N)
            g_d = jnp.dot(w2_t, s_d, preferred_element_type=jnp.float32)      # (C, N)
            gsq = gsq + g_d * g_d
        grad_norms = jnp.sqrt(gsq)                       # ||grads||_2 over coord dim
        # losses['manifold_eikonal'] = |grad_norms - 1|.mean()
        eik_loss = jnp.sum(jnp.abs(grad_norms - 1.0), keepdims=True) / (n_out * n_nodes)

        w_norm = scal_ref[2]
        w_eik = scal_ref[3]
        w_geo = scal_ref[4]

        if compute_geodesic:
            alpha = scal_ref[0]                           # SMEM scalars -> no recompile
            beta = scal_ref[1]
            base = bd_ref[0]                              # (P, T)
            deep = bd_ref[1]                              # (P, T)
            corrected = jnp.sqrt(alpha * base * base + beta * deep * deep)    # (P, T)
            n_pairs, n_steps = corrected.shape
            # (sum x)^2 - T * sum(x^2) == -T^2 * Var(x); compute via the
            # centered form to avoid catastrophic cancellation in f32.
            row_mean = jnp.sum(corrected, axis=1, keepdims=True) / n_steps    # (P, 1)
            centered = corrected - row_mean
            var = jnp.sum(centered * centered, axis=1, keepdims=True) / n_steps
            diff = (n_steps * n_steps) * var                                  # (P, 1)
            # nn.functional.mse_loss(lhs, rhs) = mean((lhs - rhs)^2)
            geo_loss = jnp.sum(diff * diff, keepdims=True) / n_pairs          # (1, 1)
        else:
            geo_loss = jnp.zeros((1, 1), jnp.float32)

        total_loss = w_norm * norm_loss + w_eik * eik_loss + w_geo * geo_loss

        # Pack the scalars into one lane-dense (1, 128) slab:
        #   lane 0 = manifold_norm, 1 = manifold_eikonal, 2 = geodesic,
        #   lane 3 = weighted total.
        lane = jax.lax.broadcasted_iota(jnp.int32, (1, 128), 1)
        out_ref[...] = (jnp.where(lane == 0, norm_loss, 0.0)
                        + jnp.where(lane == 1, eik_loss, 0.0)
                        + jnp.where(lane == 2, geo_loss, 0.0)
                        + jnp.where(lane == 3, total_loss, 0.0))

    return kernel


@functools.lru_cache(maxsize=None)
def _build_fused_call(n_nodes, n_dim, n_hidden, n_out, n_pairs, n_steps,
                      compute_geodesic):
    kernel = _make_fused_loss_kernel(n_nodes, n_dim, n_hidden, n_out,
                                     compute_geodesic)
    smem = pl.BlockSpec(memory_space=pltpu.MemorySpace.SMEM)
    vmem = pl.BlockSpec(memory_space=pltpu.MemorySpace.VMEM)
    n_vmem_inputs = 3 + (1 if compute_geodesic else 0)

    # Advisory cost estimate so XLA does not schedule conservatively around
    # the custom call when it lives inside a larger jitted graph.
    mxu_flops = 2 * n_nodes * n_hidden * n_out * (1 + n_dim)
    vpu_flops = (n_nodes * n_hidden * (2 * n_dim + 4)
                 + 4 * n_out * n_nodes
                 + 8 * n_pairs * n_steps)
    transcendentals = (n_hidden * n_nodes + n_out * n_nodes
                       + n_pairs * n_steps)
    bytes_accessed = 4 * (n_dim * n_nodes
                          + n_hidden * (n_dim + 1)
                          + n_out * (n_hidden + 1)
                          + 2 * n_pairs * n_steps
                          + 128 + 8)

    return pl.pallas_call(
        kernel,
        out_shape=jax.ShapeDtypeStruct((1, 128), jnp.float32),
        in_specs=[smem] + [vmem] * n_vmem_inputs,
        out_specs=vmem,
        cost_estimate=pl.CostEstimate(flops=mxu_flops + vpu_flops,
                                      transcendentals=transcendentals,
                                      bytes_accessed=bytes_accessed),
    )


@functools.partial(jax.jit, static_argnames=('compute_geodesic',))
def fused_graph_losses(coords, w1, b1, w2, b2, alpha, beta,
                       w_norm, w_eik, w_geo,
                       base_dists=None, deep_dists=None, compute_geodesic=True):
    """Returns (manifold_norm, manifold_eikonal, geodesic, weighted_total)."""
    n, d = coords.shape
    h = w1.shape[1]
    c = w2.shape[1]

    # Layout plumbing, fused by XLA under this jit: node axis last (lanes),
    # biases packed next to their weights so the kernel sees 4-5 inputs total.
    coords_t = coords.T                                   # (D, N)
    w1b1 = jnp.concatenate([w1.T, b1.T], axis=1)          # (H, D+1)
    w2b2 = jnp.concatenate([w2.T, b2.T], axis=1)          # (C, H+1)
    scal = jnp.asarray([alpha, beta, w_norm, w_eik, w_geo], jnp.float32)

    if compute_geodesic:
        p, t = base_dists.shape
        bd = jnp.stack([base_dists, deep_dists], axis=0)  # (2, P, T)
        call = _build_fused_call(n, d, h, c, p, t, True)
        slab = call(scal, coords_t, w1b1, w2b2, bd)
    else:
        call = _build_fused_call(n, d, h, c, 0, 0, False)
        slab = call(scal, coords_t, w1b1, w2b2)

    # Slice inside the jit (no extra eager gather dispatches).
    return slab[0, 0], slab[0, 1], slab[0, 2], slab[0, 3]


# ----------------------------------------------------------------------------
# GraphLoss wrapper mirroring the PyTorch module's control flow
# ----------------------------------------------------------------------------
class GraphLoss:
    def __init__(self, weights, params):
        self.weights = weights
        self.params = params

    def forward(self, coords, encoder_params, base_dists, deep_dists, alpha, beta):
        assert self.weights['manifold_norm'] > 0, 'Manifold loss must be enabled'
        if self.weights['orthogonal'] > 0:
            raise NotImplementedError('Orthogonal loss for graphs is not implemented yet')
        if self.weights['manifold_div'] > 0:
            raise NotImplementedError('Manifold div not implemented for graphs')
        if (self.weights['non_manifold_norm'] > 0
                or self.weights['non_manifold_eikonal'] > 0
                or self.weights['non_manifold_div'] > 0):
            raise NotImplementedError('Non-manifold points loss for graphs is not implemented yet')

        w1, b1, w2, b2 = encoder_params
        compute_geodesic = self.weights['geodesic'] > 0

        # TODO(synk): PyG Batch.index_select / manifold.distance (and the
        # debug prints around them) have no Pallas equivalent; base/deep path
        # distances are provided directly.
        norm_loss, eik_loss, geo_loss, _total = fused_graph_losses(
            coords, w1, b1, w2, b2, alpha, beta,
            self.weights['manifold_norm'], self.weights['manifold_eikonal'],
            self.weights['geodesic'],
            base_dists=base_dists, deep_dists=deep_dists,
            compute_geodesic=compute_geodesic)

        losses = {'manifold_norm': norm_loss}
        if self.weights['manifold_eikonal'] > 0:
            losses['manifold_eikonal'] = eik_loss
        if compute_geodesic:
            losses['geodesic'] = geo_loss
        return losses


if __name__ == "__main__":
    key = jax.random.PRNGKey(0)
    N, D, H, C = 128, 3, 32, 4       # 8 graphs x 16 nodes, 3-D coords, 4 encoder outputs
    P, T = 8, 16                     # geodesic: 8 graph pairs, 16 path steps

    k = jax.random.split(key, 7)
    coords = jax.random.normal(k[0], (N, D), jnp.float32)
    w1 = 0.5 * jax.random.normal(k[1], (D, H), jnp.float32)
    b1 = 0.1 * jax.random.normal(k[2], (1, H), jnp.float32)
    w2 = 0.5 * jax.random.normal(k[3], (H, C), jnp.float32)
    b2 = 0.1 * jax.random.normal(k[4], (1, C), jnp.float32)
    base_dists = jnp.abs(jax.random.normal(k[5], (P, T), jnp.float32))
    deep_dists = jnp.abs(jax.random.normal(k[6], (P, T), jnp.float32))

    weights = dict(manifold_norm=1.0, manifold_eikonal=1.0, orthogonal=0.0,
                   manifold_div=0.0, non_manifold_norm=0.0,
                   non_manifold_eikonal=0.0, non_manifold_div=0.0, geodesic=1.0)
    params = dict(non_manifold_eps=0.1)

    loss_mod = GraphLoss(weights, params)
    losses = loss_mod.forward(coords, (w1, b1, w2, b2), base_dists, deep_dists,
                              alpha=1.0, beta=0.5)
    jax.block_until_ready(losses)
    print("KERNEL_OK")
</pallas_src>

<mosaic_0001>
module attributes {stable_mosaic.version = 11 : i64} {
  func.func @kernel(%arg0: memref<5xf32, #tpu.memory_space<smem>>, %arg1: memref<3x128xf32, #tpu.memory_space<vmem>>, %arg2: memref<32x4xf32, #tpu.memory_space<vmem>>, %arg3: memref<4x33xf32, #tpu.memory_space<vmem>>, %arg4: memref<2x8x16xf32, #tpu.memory_space<vmem>>, %arg5: memref<1x128xf32, #tpu.memory_space<vmem>>) attributes {dimension_semantics = [], scalar_prefetch = 0 : i64, scratch_operands = 0 : i64, tpu.core_type = #tpu.core_type<tc>} {
    %c0 = arith.constant 0 : index
    %c0_0 = arith.constant 0 : index
    %0 = vector.load %arg1[%c0, %c0_0] : memref<3x128xf32, #tpu.memory_space<vmem>>, vector<3x128xf32>
    %c0_1 = arith.constant 0 : index
    %c0_2 = arith.constant 0 : index
    %1 = vector.load %arg2[%c0_1, %c0_2] : memref<32x4xf32, #tpu.memory_space<vmem>>, vector<32x4xf32>
    %c0_3 = arith.constant 0 : index
    %c0_4 = arith.constant 0 : index
    %2 = vector.load %arg3[%c0_3, %c0_4] : memref<4x33xf32, #tpu.memory_space<vmem>>, vector<4x33xf32>
    %3 = vector.extract_strided_slice %2 {offsets = [0, 0], sizes = [4, 32], strides = [1, 1]} : vector<4x33xf32> to vector<4x32xf32>
    %4 = vector.extract_strided_slice %2 {offsets = [0, 32], sizes = [4, 1], strides = [1, 1]} : vector<4x33xf32> to vector<4x1xf32>
    %5 = vector.extract_strided_slice %1 {offsets = [0, 3], sizes = [32, 1], strides = [1, 1]} : vector<32x4xf32> to vector<32x1xf32>
    %6 = vector.shape_cast %5 : vector<32x1xf32> to vector<32x1xf32>
    %7 = vector.broadcast %6 : vector<32x1xf32> to vector<32x128xf32>
    %8 = vector.extract_strided_slice %1 {offsets = [0, 0], sizes = [32, 1], strides = [1, 1]} : vector<32x4xf32> to vector<32x1xf32>
    %9 = vector.extract_strided_slice %0 {offsets = [0, 0], sizes = [1, 128], strides = [1, 1]} : vector<3x128xf32> to vector<1x128xf32>
    %10 = vector.broadcast %8 : vector<32x1xf32> to vector<32x128xf32>
    %11 = vector.broadcast %9 : vector<1x128xf32> to vector<32x128xf32>
    %12 = arith.mulf %10, %11 : vector<32x128xf32>
    %13 = arith.addf %7, %12 : vector<32x128xf32>
    %14 = vector.extract_strided_slice %1 {offsets = [0, 1], sizes = [32, 1], strides = [1, 1]} : vector<32x4xf32> to vector<32x1xf32>
    %15 = vector.extract_strided_slice %0 {offsets = [1, 0], sizes = [1, 128], strides = [1, 1]} : vector<3x128xf32> to vector<1x128xf32>
    %16 = vector.broadcast %14 : vector<32x1xf32> to vector<32x128xf32>
    %17 = vector.broadcast %15 : vector<1x128xf32> to vector<32x128xf32>
    %18 = arith.mulf %16, %17 : vector<32x128xf32>
    %19 = arith.addf %13, %18 : vector<32x128xf32>
    %20 = vector.extract_strided_slice %1 {offsets = [0, 2], sizes = [32, 1], strides = [1, 1]} : vector<32x4xf32> to vector<32x1xf32>
    %21 = vector.extract_strided_slice %0 {offsets = [2, 0], sizes = [1, 128], strides = [1, 1]} : vector<3x128xf32> to vector<1x128xf32>
    %22 = vector.broadcast %20 : vector<32x1xf32> to vector<32x128xf32>
    %23 = vector.broadcast %21 : vector<1x128xf32> to vector<32x128xf32>
    %24 = arith.mulf %22, %23 : vector<32x128xf32>
    %25 = arith.addf %19, %24 : vector<32x128xf32>
    %26 = math.tanh %25 : vector<32x128xf32>
    %cst = arith.constant dense<0.000000e+00> : vector<4x128xf32>
    %27 = tpu.matmul %3, %26, %cst {dimension_numbers = #tpu.dot_dimension_numbers<[1], [0], [0], [1], [0, 0, 1, 1], [], []>} : vector<4x32xf32>, vector<32x128xf32>, vector<4x128xf32> -> vector<4x128xf32>
    %28 = vector.broadcast %4 : vector<4x1xf32> to vector<4x128xf32>
    %29 = arith.addf %27, %28 : vector<4x128xf32>
    %30 = math.absf %29 : vector<4x128xf32>
    %31 = vector.shape_cast %30 : vector<4x128xf32> to vector<1x4x128xf32>
    %cst_5 = arith.constant dense<0.000000e+00> : vector<1xf32>
    %32 = vector.multi_reduction <add>, %31, %cst_5 [1, 2] : vector<1x4x128xf32> to vector<1xf32>
    %33 = vector.shape_cast %32 : vector<1xf32> to vector<1x1x1xf32>
    %34 = vector.extract %33[0, 0, 0] : f32 from vector<1x1x1xf32>
    %35 = vector.broadcast %34 : f32 to vector<1x1xf32>
    %cst_6 = arith.constant 1.280000e+02 : f32
    %36 = vector.broadcast %cst_6 : f32 to vector<1x1xf32>
    %37 = arith.divf %35, %36 : vector<1x1xf32>
    %38 = arith.mulf %26, %26 : vector<32x128xf32>
    %cst_7 = arith.constant 1.000000e+00 : f32
    %39 = vector.broadcast %cst_7 : f32 to vector<32x128xf32>
    %40 = arith.subf %39, %38 : vector<32x128xf32>
    %cst_8 = arith.constant 0.000000e+00 : f32
    %41 = vector.broadcast %cst_8 : f32 to vector<4x128xf32>
    %42 = vector.extract_strided_slice %1 {offsets = [0, 0], sizes = [32, 1], strides = [1, 1]} : vector<32x4xf32> to vector<32x1xf32>
    %43 = vector.broadcast %42 : vector<32x1xf32> to vector<32x128xf32>
    %44 = arith.mulf %40, %43 : vector<32x128xf32>
    %cst_9 = arith.constant dense<0.000000e+00> : vector<4x128xf32>
    %45 = tpu.matmul %3, %44, %cst_9 {dimension_numbers = #tpu.dot_dimension_numbers<[1], [0], [0], [1], [0, 0, 1, 1], [], []>} : vector<4x32xf32>, vector<32x128xf32>, vector<4x128xf32> -> vector<4x128xf32>
    %46 = arith.mulf %45, %45 : vector<4x128xf32>
    %47 = arith.addf %41, %46 : vector<4x128xf32>
    %48 = vector.extract_strided_slice %1 {offsets = [0, 1], sizes = [32, 1], strides = [1, 1]} : vector<32x4xf32> to vector<32x1xf32>
    %49 = vector.broadcast %48 : vector<32x1xf32> to vector<32x128xf32>
    %50 = arith.mulf %40, %49 : vector<32x128xf32>
    %cst_10 = arith.constant dense<0.000000e+00> : vector<4x128xf32>
    %51 = tpu.matmul %3, %50, %cst_10 {dimension_numbers = #tpu.dot_dimension_numbers<[1], [0], [0], [1], [0, 0, 1, 1], [], []>} : vector<4x32xf32>, vector<32x128xf32>, vector<4x128xf32> -> vector<4x128xf32>
    %52 = arith.mulf %51, %51 : vector<4x128xf32>
    %53 = arith.addf %47, %52 : vector<4x128xf32>
    %54 = vector.extract_strided_slice %1 {offsets = [0, 2], sizes = [32, 1], strides = [1, 1]} : vector<32x4xf32> to vector<32x1xf32>
    %55 = vector.broadcast %54 : vector<32x1xf32> to vector<32x128xf32>
    %56 = arith.mulf %40, %55 : vector<32x128xf32>
    %cst_11 = arith.constant dense<0.000000e+00> : vector<4x128xf32>
    %57 = tpu.matmul %3, %56, %cst_11 {dimension_numbers = #tpu.dot_dimension_numbers<[1], [0], [0], [1], [0, 0, 1, 1], [], []>} : vector<4x32xf32>, vector<32x128xf32>, vector<4x128xf32> -> vector<4x128xf32>
    %58 = arith.mulf %57, %57 : vector<4x128xf32>
    %59 = arith.addf %53, %58 : vector<4x128xf32>
    %60 = math.sqrt %59 : vector<4x128xf32>
    %cst_12 = arith.constant 1.000000e+00 : f32
    %61 = vector.broadcast %cst_12 : f32 to vector<4x128xf32>
    %62 = arith.subf %60, %61 : vector<4x128xf32>
    %63 = math.absf %62 : vector<4x128xf32>
    %64 = vector.shape_cast %63 : vector<4x128xf32> to vector<1x4x128xf32>
    %cst_13 = arith.constant dense<0.000000e+00> : vector<1xf32>
    %65 = vector.multi_reduction <add>, %64, %cst_13 [1, 2] : vector<1x4x128xf32> to vector<1xf32>
    %66 = vector.shape_cast %65 : vector<1xf32> to vector<1x1x1xf32>
    %67 = vector.extract %66[0, 0, 0] : f32 from vector<1x1x1xf32>
    %68 = vector.broadcast %67 : f32 to vector<1x1xf32>
    %cst_14 = arith.constant 5.120000e+02 : f32
    %69 = vector.broadcast %cst_14 : f32 to vector<1x1xf32>
    %70 = arith.divf %68, %69 : vector<1x1xf32>
    %c2 = arith.constant 2 : index
    %71 = memref.load %arg0[%c2] : memref<5xf32, #tpu.memory_space<smem>>
    %c3 = arith.constant 3 : index
    %72 = memref.load %arg0[%c3] : memref<5xf32, #tpu.memory_space<smem>>
    %c4 = arith.constant 4 : index
    %73 = memref.load %arg0[%c4] : memref<5xf32, #tpu.memory_space<smem>>
    %c0_15 = arith.constant 0 : index
    %74 = memref.load %arg0[%c0_15] : memref<5xf32, #tpu.memory_space<smem>>
    %c1 = arith.constant 1 : index
    %75 = memref.load %arg0[%c1] : memref<5xf32, #tpu.memory_space<smem>>
    %c0_16 = arith.constant 0 : index
    %c0_17 = arith.constant 0 : index
    %c0_18 = arith.constant 0 : index
    %76 = vector.load %arg4[%c0_16, %c0_17, %c0_18] : memref<2x8x16xf32, #tpu.memory_space<vmem>>, vector<1x8x16xf32>
    %77 = vector.shape_cast %76 : vector<1x8x16xf32> to vector<8x16xf32>
    %c1_19 = arith.constant 1 : index
    %c0_20 = arith.constant 0 : index
    %c0_21 = arith.constant 0 : index
    %78 = vector.load %arg4[%c1_19, %c0_20, %c0_21] : memref<2x8x16xf32, #tpu.memory_space<vmem>>, vector<1x8x16xf32>
    %79 = vector.shape_cast %78 : vector<1x8x16xf32> to vector<8x16xf32>
    %80 = vector.broadcast %74 : f32 to vector<8x16xf32>
    %81 = arith.mulf %80, %77 : vector<8x16xf32>
    %82 = arith.mulf %81, %77 : vector<8x16xf32>
    %83 = vector.broadcast %75 : f32 to vector<8x16xf32>
    %84 = arith.mulf %83, %79 : vector<8x16xf32>
    %85 = arith.mulf %84, %79 : vector<8x16xf32>
    %86 = arith.addf %82, %85 : vector<8x16xf32>
    %87 = math.sqrt %86 : vector<8x16xf32>
    %cst_22 = arith.constant dense<0.000000e+00> : vector<8xf32>
    %88 = vector.multi_reduction <add>, %87, %cst_22 [1] : vector<8x16xf32> to vector<8xf32>
    %89 = vector.shape_cast %88 : vector<8xf32> to vector<8x1xf32>
    %cst_23 = arith.constant 1.600000e+01 : f32
    %90 = vector.broadcast %cst_23 : f32 to vector<8x1xf32>
    %91 = arith.divf %89, %90 : vector<8x1xf32>
    %92 = vector.broadcast %91 : vector<8x1xf32> to vector<8x16xf32>
    %93 = arith.subf %87, %92 : vector<8x16xf32>
    %94 = arith.mulf %93, %93 : vector<8x16xf32>
    %cst_24 = arith.constant dense<0.000000e+00> : vector<8xf32>
    %95 = vector.multi_reduction <add>, %94, %cst_24 [1] : vector<8x16xf32> to vector<8xf32>
    %96 = vector.shape_cast %95 : vector<8xf32> to vector<8x1xf32>
    %cst_25 = arith.constant 1.600000e+01 : f32
    %97 = vector.broadcast %cst_25 : f32 to vector<8x1xf32>
    %98 = arith.divf %96, %97 : vector<8x1xf32>
    %cst_26 = arith.constant 2.560000e+02 : f32
    %99 = vector.broadcast %cst_26 : f32 to vector<8x1xf32>
    %100 = arith.mulf %99, %98 : vector<8x1xf32>
    %101 = arith.mulf %100, %100 : vector<8x1xf32>
    %102 = vector.shape_cast %101 : vector<8x1xf32> to vector<1x8x1xf32>
    %cst_27 = arith.constant dense<0.000000e+00> : vector<1xf32>
    %103 = vector.multi_reduction <add>, %102, %cst_27 [1, 2] : vector<1x8x1xf32> to vector<1xf32>
    %104 = vector.shape_cast %103 : vector<1xf32> to vector<1x1x1xf32>
    %105 = vector.extract %104[0, 0, 0] : f32 from vector<1x1x1xf32>
    %106 = vector.broadcast %105 : f32 to vector<1x1xf32>
    %cst_28 = arith.constant 8.000000e+00 : f32
    %107 = vector.broadcast %cst_28 : f32 to vector<1x1xf32>
    %108 = arith.divf %106, %107 : vector<1x1xf32>
    %109 = vector.broadcast %71 : f32 to vector<1x1xf32>
    %110 = arith.mulf %109, %37 : vector<1x1xf32>
    %111 = vector.broadcast %72 : f32 to vector<1x1xf32>
    %112 = arith.mulf %111, %70 : vector<1x1xf32>
    %113 = arith.addf %110, %112 : vector<1x1xf32>
    %114 = vector.broadcast %73 : f32 to vector<1x1xf32>
    %115 = arith.mulf %114, %108 : vector<1x1xf32>
    %116 = arith.addf %113, %115 : vector<1x1xf32>
    %117 = tpu.iota {dimensions = array<i32: 1>} : vector<1x128xi32>
    %c0_i32 = arith.constant 0 : i32
    %118 = vector.broadcast %c0_i32 : i32 to vector<1x128xi32>
    %119 = arith.cmpi eq, %117, %118 : vector<1x128xi32>
    %cst_29 = arith.constant 0.000000e+00 : f32
    %120 = vector.shape_cast %37 : vector<1x1xf32> to vector<1x1xf32>
    %121 = vector.broadcast %120 : vector<1x1xf32> to vector<1x128xf32>
    %122 = vector.broadcast %cst_29 : f32 to vector<1x128xf32>
    %123 = arith.select %119, %121, %122 : vector<1x128xi1>, vector<1x128xf32>
    %c1_i32 = arith.constant 1 : i32
    %124 = vector.broadcast %c1_i32 : i32 to vector<1x128xi32>
    %125 = arith.cmpi eq, %117, %124 : vector<1x128xi32>
    %cst_30 = arith.constant 0.000000e+00 : f32
    %126 = vector.shape_cast %70 : vector<1x1xf32> to vector<1x1xf32>
    %127 = vector.broadcast %126 : vector<1x1xf32> to vector<1x128xf32>
    %128 = vector.broadcast %cst_30 : f32 to vector<1x128xf32>
    %129 = arith.select %125, %127, %128 : vector<1x128xi1>, vector<1x128xf32>
    %130 = arith.addf %123, %129 : vector<1x128xf32>
    %c2_i32 = arith.constant 2 : i32
    %131 = vector.broadcast %c2_i32 : i32 to vector<1x128xi32>
    %132 = arith.cmpi eq, %117, %131 : vector<1x128xi32>
    %cst_31 = arith.constant 0.000000e+00 : f32
    %133 = vector.shape_cast %108 : vector<1x1xf32> to vector<1x1xf32>
    %134 = vector.broadcast %133 : vector<1x1xf32> to vector<1x128xf32>
    %135 = vector.broadcast %cst_31 : f32 to vector<1x128xf32>
    %136 = arith.select %132, %134, %135 : vector<1x128xi1>, vector<1x128xf32>
    %137 = arith.addf %130, %136 : vector<1x128xf32>
    %c3_i32 = arith.constant 3 : i32
    %138 = vector.broadcast %c3_i32 : i32 to vector<1x128xi32>
    %139 = arith.cmpi eq, %117, %138 : vector<1x128xi32>
    %cst_32 = arith.constant 0.000000e+00 : f32
    %140 = vector.shape_cast %116 : vector<1x1xf32> to vector<1x1xf32>
    %141 = vector.broadcast %140 : vector<1x1xf32> to vector<1x128xf32>
    %142 = vector.broadcast %cst_32 : f32 to vector<1x128xf32>
    %143 = arith.select %139, %141, %142 : vector<1x128xi1>, vector<1x128xf32>
    %144 = arith.addf %137, %143 : vector<1x128xf32>
    %c0_33 = arith.constant 0 : index
    %c0_34 = arith.constant 0 : index
    %145 = vector.load %arg5[%c0_33, %c0_34] : memref<1x128xf32, #tpu.memory_space<vmem>>, vector<1x128xf32>
    tpu.vector_store %arg5[%c0_33, %c0_34], %144 {strides = array<i32>} : memref<1x128xf32, #tpu.memory_space<vmem>>, vector<1x128xf32>,
    return
  }
}

</mosaic_0001>

<bundles_post_ra>
// kernel: fused_graph_losses.1
= control target key start
LH: loop header
LB: loop body
LE: loop exit
PB: predicated region body
PF: predicated region fallthrough
CT: control target
= control target key end

     0   :  { %10 = vsyncpa [#allocation3], 0  ;;  %s475_s21 = smov [#allocation2]   ;;  %s573_s0 = inlined_call_operand.vmem [shape: f32[5], index: 0, kind: input, shape index: {}]   ;;  %s574_s1 = inlined_call_operand.vmem [shape: f32[3,128], index: 1, kind: input, shape index: {}]   ;;  %s575_s2 = inlined_call_operand.vmem [shape: f32[32,4], index: 2, kind: input, shape index: {}]   ;;  %s576_s3 = inlined_call_operand.vmem [shape: f32[4,33], index: 3, kind: input, shape index: {}]   ;;  %s577_s4 = inlined_call_operand.vmem [shape: f32[2,8,16], index: 4, kind: input, shape index: {}]   ;;  %s578_s5 = inlined_call_operand.vmem [shape: f32[1,128], index: 5, kind: output, shape index: {}]  }
   0x1   :  { %s16_s20 = sshll.u32 %s573_s0, 4  ;;  %s17_s20 = int_to_ptr.vmem [resolvable:$true] %s16_s20 }
   0x2   :  { %19 = dma.vmem_to_smem %s17_s20, 16, %s475_s21, [#allocation3]  }
   0x3   :  { %473 = dma.done.wait [#allocation3], 16  }
   0x4   :  { %474 = vsyncadd [#allocation3], 4294967280 }
   0x5   :  { %32 = sfence }
   0x6   :  { %v37_v0 = vld [vmem:[%s575_s2 + $0x18] sm:$0xff]  ;;  %v36_v1 = vld [vmem:[%s575_s2 + $0x10] sm:$0xff]  ;;  %v476_v2 = vmov 0   ;;  %v477_v3 = vmov 3   ;;  %s309_s0 = sld [smem:[#allocation2]]  ;;  %v478_v4 = vmov 1  }
   0x7   :  { %428 = vset.pattern.permute.xlu1 %v476_v2  ;;  %426 = vset.pattern.permute.xlu0 %v476_v2  ;;  %s408_s26 = sld [smem:[#allocation2 + $0x1]]  ;;  %v35_v5 = vld [vmem:[%s575_s2 + $0x8] sm:$0xff]  ;;  %v311_v6 = vld [vmem:[%s577_s4] sm:$0xff]  ;;  %v479_v14 = vmov 2   ;;  %vm333_vm2 = vcmask 130048   ;;  %vm143_vm3 = vcmask 261120  }
   0x8   :  { %72 = vperm.xlu0 %426, %v37_v0   ;;  %68 = vperm.xlu1 %428, %v36_v1   ;;  %v409_v7 = vld [vmem:[%s577_s4 + $0x8] sm:$0xff]  ;;  %v34_v16 = vld [vmem:[%s575_s2] sm:$0xff]  ;;  %vm167_vm5 = vcmask 1043456   ;;  %vm353_vm6 = vcmask 7168   ;;  %s406_s11 = sld [smem:[#allocation2 + $0x3]] }
   0x9   :  { %430 = vset.pattern.permute.xlu2 %v477_v3  ;;  %v33_v32 = vld [vmem:[%s574_s1] sm:$0x7]  ;;  %s407_s13 = sld [smem:[#allocation2 + $0x4]] }
   0xa   :  { %51 = vperm.xlu2 %430, %v36_v1   ;;  %v75_v33 = vperm.slane %v33_v32, 0  ;;  %v100_v35 = vperm.slane %v33_v32, 1  ;;  %v125_v37 = vperm.slane %v33_v32, 2 }
   0xc   :  { %v314_v8 = vstv %s309_s0 }
   0xd   :  { %v317_v9 = vstv %s408_s26  ;;  %v315_v10 = vmul.f32 %v314_v8, %v311_v6 }
   0xe   :  { %v318_v11 = vmul.f32 %v409_v7, %v317_v9 }
   0xf   :  { %v316_v12 = vmul.f32 %v315_v10, %v311_v6 }
  0x10   :  { %427 = vset.pattern.permute.xlu0 %v477_v3  ;;  %429 = vset.pattern.permute.xlu1 %v478_v4  ;;  %v319_v13 = vmul.f32 %v409_v7, %v318_v11 }
  0x11   :  { %56 = vperm.xlu0 %427, %v37_v0   ;;  %97 = vperm.xlu1 %429, %v37_v0  }
  0x12   :  { %431 = vset.pattern.permute.xlu2 %v476_v2  ;;  %v320_v15 = vadd.f32 %v319_v13, %v316_v12 }
  0x13   :  { %64 = vperm.xlu2 %431, %v35_v5  }
  0x14   :  { %441 = vrsqrt.f32 %v320_v15  ;;  %vm328_vm0 = vcmp.eq.f32.partialorder %v320_v15, inf  ;;  %v331_v24 = vand.u32 2147483648, %v320_v15  ;;  %vm330_vm1 = vcmp.eq.f32.partialorder %v320_v15, 0.0 }
  0x19   :  { %93 = vperm.xlu1 %429, %v36_v1   ;;  %46 = vperm.xlu0 %427, %v35_v5  }
  0x1a   :  { %v442_v17 = vpop.eup %441 }
  0x1b   :  { %432 = vset.pattern.permute.xlu2 %v479_v14  ;;  %v322_v18 = vmul.f32 %v442_v17, %v320_v15 }
  0x1c   :  { %122 = vperm.xlu2 %432, %v37_v0  }
  0x1d   :  { %v323_v19 = vmul.f32 %v442_v17, %v322_v18 }
  0x1f   :  { %v324_v20 = vmul.f32 0.5, %v323_v19 }
  0x21   :  { %433 = vset.pattern.permute.xlu1 %v476_v2  ;;  %435 = vset.pattern.permute.xlu0 %v479_v14  ;;  %v325_v21 = vsub.f32 1.5, %v324_v20  ;;  %v38_v20 = vld [vmem:[%s576_s3] sm:$0xf]  ;;  %s405_s3 = sld [smem:[#allocation2 + $0x2]] }
  0x22   :  { %118 = vperm.xlu0 %435, %v36_v1   ;;  %60 = vperm.xlu1 %433, %v34_v16  }
  0x23   :  { %v326_v22 = vmul.f32 %v442_v17, %v325_v21  ;;  %v481_v21 = vmov 32  }
  0x24   :  { %434 = vset.pattern.permute.xlu2 %v478_v4 }
  0x25   :  { %89 = vperm.xlu2 %434, %v35_v5   ;;  %v327_v23 = vmul.f32 %v326_v22, %v320_v15 }
  0x27   :  { %v329_v25 = vsel %vm328_vm0, %v320_v15, %v327_v23 }
  0x28   :  { %v536_v26 = vsel %vm330_vm1, %v331_v24, %v329_v25 }
  0x29   :  { %v334_v27 = vsel %vm333_vm2, %v536_v26, 0.0 }
  0x2a   :  { %436 = vset.pattern.permute.xlu1 %v477_v3  ;;  %440 = vset.pattern.permute.xlu0 %v481_v21 }
  0x2b   :  { %41 = vperm.xlu1 %436, %v34_v16  }
  0x2d   :  { %85 = vperm.xlu2 %434, %v34_v16  }
  0x33   :  { %437 = vset.pattern.permute.xlu1 %v479_v14 }
  0x34   :  { %114 = vperm.xlu1 %437, %v35_v5  }
  0x35   :  { %438 = vset.pattern.permute.xlu2 %v479_v14 }
  0x36   :  { %110 = vperm.xlu2 %438, %v34_v16   ;;  %v480_v16 = vmov 16.0  }
  0x3e   :  { %439 = vset.pattern.permute.xlu2 %v481_v21 }
  0x3f   :  { %140 = vperm.xlu2 %439, %v38_v20  }
  0x4c   :  { %335 = vadd.xlane.f32.xlu0 %v334_v27 }
  0x64   :  { %v52_v28 = vpop.permute.xlu2 %51 }
  0x6d   :  { %v540_v29 = vpop.permute.xlu2 %64 }
  0x6e   :  { %v77_v8 = vmul.f32 %v75_v33, %v540_v29 }
  0x76   :  { %v123_v36 = vpop.permute.xlu2 %122 }
  0x77   :  { %v129_v42 = vmul.f32 %v125_v37, %v123_v36 }
  0x7a   :  { %v69_v30 = vpop.permute.xlu1 %68  ;;  %v73_v31 = vpop.permute.xlu0 %72 }
  0x7b   :  { %v79_v34 = vmul.f32 %v75_v33, %v73_v31  ;;  %v78_v48 = vmul.f32 %v75_v33, %v69_v30 }
  0x7d   :  { %v82_v53 = vadd.f32 %v78_v48, %v52_v28 }
  0x7f   :  { %v545_v45 = vpop.permute.xlu2 %89 }
  0x80   :  { %v102_v11 = vmul.f32 %v100_v35, %v545_v45 }
  0x83   :  { %v57_v38 = vpop.permute.xlu0 %56  ;;  %v98_v39 = vpop.permute.xlu1 %97 }
  0x84   :  { %v83_v40 = vadd.f32 %v79_v34, %v57_v38  ;;  %v104_v41 = vmul.f32 %v100_v35, %v98_v39 }
  0x86   :  { %v108_v43 = vadd.f32 %v104_v41, %v83_v40 }
  0x87   :  { %v547_v52 = vpop.permute.xlu2 %85 }
  0x88   :  { %v133_v44 = vadd.f32 %v129_v42, %v108_v43  ;;  %v101_v2 = vmul.f32 %v100_v35, %v547_v52 }
  0x8a   :  { %443 = vtanh.f32 %v133_v44 }
  0x8b   :  { %v94_v46 = vpop.permute.xlu1 %93  ;;  %v47_v47 = vpop.permute.xlu0 %46 }
  0x8c   :  { %v103_v50 = vmul.f32 %v100_v35, %v94_v46  ;;  %v81_v10 = vadd.f32 %v77_v8, %v47_v47 }
  0x8e   :  { %v107_v57 = vadd.f32 %v103_v50, %v82_v53  ;;  %v106_v18 = vadd.f32 %v102_v11, %v81_v10 }
  0x90   :  { %v444_v49 = vpop.eup %443  ;;  %v111_v0 = vpop.permute.xlu2 %110 }
  0x91   :  { %158 = vmatpush.msra.mxu0 %v444_v49  ;;  %v190_v51 = vmul.f32 %v444_v49, %v444_v49  ;;  %v126_v5 = vmul.f32 %v125_v37, %v111_v0 }
  0x93   :  { %v194_v54 = vsub.f32 1.0, %v190_v51 }
  0x94   :  { %v119_v55 = vpop.permute.xlu0 %118  ;;  %v549_v56 = vpop.permute.xlu1 %60 }
  0x95   :  { %v128_v58 = vmul.f32 %v125_v37, %v119_v55  ;;  %v198_v59 = vmul.f32 %v194_v54, %v73_v31  ;;  %v224_v60 = vmul.f32 %v194_v54, %v98_v39  ;;  %v250_v61 = vmul.f32 %v194_v54, %v123_v36 }
  0x96   :  { %v76_v63 = vmul.f32 %v75_v33, %v549_v56 }
  0x97   :  { %v132_v62 = vadd.f32 %v128_v58, %v107_v57  ;;  %211 = vmatpush.msra.mxu1 %v198_v59  ;;  %237 = vmatpush.msra.mxu2 %v224_v60 }
  0x98   :  { %263 = vmatpush.msra.mxu3 %v250_v61 }
  0x99   :  { %445 = vtanh.f32 %v132_v62  ;;  %v141_v47 = vpop.permute.xlu2 %140 }
  0x9a   :  { %447 = vrcp.f32 %v480_v16 }
  0x9d   :  { %v42_v1 = vpop.permute.xlu1 %41 }
  0x9e   :  { %v80_v3 = vadd.f32 %v76_v63, %v42_v1 }
  0x9f   :  { %v446_v4 = vpop.eup %445 }
  0xa0   :  { %v105_v6 = vadd.f32 %v101_v2, %v80_v3  ;;  %159 = vmatpush.msra.mxu0 %v446_v4  ;;  %v189_v7 = vmul.f32 %v446_v4, %v446_v4  ;;  %v448_v23 = vpop.eup %447 }
  0xa1   :  { %v338_v25 = vmul.f32 16.0, %v448_v23  ;;  %vm342_vm4 = vweird.f32 %v448_v23 }
  0xa2   :  { %v193_v9 = vsub.f32 1.0, %v189_v7  ;;  %v130_v12 = vadd.f32 %v126_v5, %v105_v6 }
  0xa4   :  { %v197_v13 = vmul.f32 %v193_v9, %v69_v30  ;;  %v223_v14 = vmul.f32 %v193_v9, %v94_v46  ;;  %v249_v15 = vmul.f32 %v193_v9, %v119_v55  ;;  %449 = vtanh.f32 %v130_v12 }
  0xa5   :  { %v339_v30 = vsub.f32 1.0, %v338_v25 }
  0xa6   :  { %v115_v17 = vpop.permute.xlu1 %114  ;;  %212 = vmatpush.msra.mxu1 %v197_v13  ;;  %238 = vmatpush.msra.mxu2 %v223_v14 }
  0xa7   :  { %v127_v19 = vmul.f32 %v125_v37, %v115_v17  ;;  %264 = vmatpush.msra.mxu3 %v249_v15  ;;  %v340_v34 = vmul.f32 %v448_v23, %v339_v30 }
  0xa9   :  { %v131_v22 = vadd.f32 %v127_v19, %v106_v18  ;;  %v341_v41 = vadd.f32 %v448_v23, %v340_v34 }
  0xaa   :  { %v450_v24 = vpop.eup %449 }
  0xab   :  { %451 = vtanh.f32 %v131_v22  ;;  %v187_v27 = vmul.f32 %v450_v24, %v450_v24 }
  0xad   :  { %v191_v33 = vsub.f32 1.0, %v187_v27 }
  0xaf   :  { %v195_v38 = vmul.f32 %v191_v33, %v549_v56  ;;  %v221_v39 = vmul.f32 %v191_v33, %v547_v52  ;;  %v247_v40 = vmul.f32 %v191_v33, %v111_v0 }
  0xb1   :  { %v452_v28 = vpop.eup %451 }
  0xb2   :  { %160 = vmatpush.msra.mxu0 %v452_v28  ;;  %v188_v31 = vmul.f32 %v452_v28, %v452_v28 }
  0xb4   :  { %161 = vmatpush.msra.mxu0 %v450_v24  ;;  %v192_v32 = vsub.f32 1.0, %v188_v31 }
  0xb5   :  { %400 = vmatmul.msk.f32.vlgmr.msra.gmra.mxu0 %vm143_vm3, %v38_v20 }
  0xb6   :  { %v196_v35 = vmul.f32 %v192_v32, %v540_v29  ;;  %v222_v36 = vmul.f32 %v192_v32, %v545_v45  ;;  %v248_v37 = vmul.f32 %v192_v32, %v115_v17  ;;  %v343_v29 = vsel %vm342_vm4, %v448_v23, %v341_v41 }
  0xb8   :  { %213 = vmatpush.msra.mxu1 %v196_v35  ;;  %239 = vmatpush.msra.mxu2 %v222_v36  ;;  %v482_v36 = vmov 128.0  }
  0xb9   :  { %265 = vmatpush.msra.mxu3 %v248_v37  ;;  %v483_v37 = vmov 512.0  }
  0xba   :  { %214 = vmatpush.msra.mxu1 %v195_v38  ;;  %240 = vmatpush.msra.mxu2 %v221_v39  ;;  %v484_v38 = vmov 8.0  }
  0xbb   :  { %266 = vmatpush.msra.mxu3 %v247_v40  ;;  %402 = vmatmul.msk.f32.vlgmr.msra.gmra.mxu2 %vm143_vm3, %v38_v20 }
  0xbc   :  { %403 = vmatmul.msk.f32.vlgmr.msra.gmra.mxu3 %vm143_vm3, %v38_v20  ;;  %401 = vmatmul.msk.f32.vlgmr.msra.gmra.mxu1 %vm143_vm3, %v38_v20 }
  0xbf   :  { %v336_v42 = vpop.xlane.xlu0 %335 }
  0xc0   :  { %v344_v43 = vmul.f32 %v343_v29, %v336_v42 }
  0xc2   :  { %v345_v44 = vsub.f32 %v536_v26, %v344_v43 }
  0xc4   :  { %v346_v45 = vmul.f32 %v345_v44, %v345_v44 }
  0xc6   :  { %v347_v46 = vsel %vm333_vm2, %v346_v45, 0.0 }
  0xc7   :  { %348 = vadd.xlane.f32.xlu1 %v347_v46 }
 0x132   :  { %v163_v48 = vpop.f32.mrf.mxu0 }
 0x133   :  { %v164_v49 = vadd.f32 %v163_v48, %v141_v47 }
 0x135   :  { %v166_v50 = vand.u32 2147483647, %v164_v49 }
 0x137   :  { %v168_v51 = vsel %vm167_vm5, %v166_v50, 0.0 }
 0x138   :  { %169 = vadd.xlane.f32.xlu2 %v168_v51  ;;  %v381_v51 = vlaneseq }
 0x139   :  { %v216_v52 = vpop.f32.mrf.mxu1 }
 0x13a   :  { %v349_v53 = vpop.xlane.xlu1 %348  ;;  %v219_v55 = vmul.f32 %v216_v52, %v216_v52 }
 0x13b   :  { %v350_v54 = vmul.f32 %v349_v53, %v343_v29 }
 0x13d   :  { %v351_v56 = vmul.f32 256.0, %v350_v54 }
 0x13e   :  { %v242_v57 = vpop.f32.mrf.mxu2 }
 0x13f   :  { %v245_v26 = vmul.f32 %v242_v57, %v242_v57  ;;  %v268_v58 = vpop.f32.mrf.mxu3  ;;  %v352_v59 = vmul.f32 %v351_v56, %v351_v56  ;;  %v382_v56 = vand.u32 127, %v381_v51 }
 0x140   :  { %v271_v60 = vmul.f32 %v268_v58, %v268_v58  ;;  %v373_v58 = vstv %s405_s3 }
 0x141   :  { %v246_v61 = vadd.f32 %v245_v26, %v219_v55  ;;  %v354_v62 = vsel %vm353_vm6, %v352_v59, 0.0  ;;  %vm383_vm12 = vcmp.eq.s32.totalorder %v382_v56, 0  ;;  %vm385_vm13 = vcmp.eq.s32.totalorder %v382_v56, 1 }
 0x142   :  { %355 = vadd.xlane.f32.xlu1 %v354_v62  ;;  %vm388_vm14 = vcmp.eq.s32.totalorder %v382_v56, 2  ;;  %vm391_vm15 = vcmp.eq.s32.totalorder %v382_v56, 3 }
 0x143   :  { %v272_v63 = vadd.f32 %v271_v60, %v246_v61  ;;  %v375_v61 = vstv %s406_s11 }
 0x145   :  { %453 = vrsqrt.f32 %v272_v63  ;;  %vm280_vm7 = vcmp.eq.f32.partialorder %v272_v63, inf  ;;  %v283_v7 = vand.u32 2147483648, %v272_v63  ;;  %vm282_vm8 = vcmp.eq.f32.partialorder %v272_v63, 0.0 }
 0x146   :  { %455 = vrcp.f32 %v482_v36 }
 0x147   :  { %457 = vrcp.f32 %v483_v37 }
 0x148   :  { %459 = vrcp.f32 %v484_v38 }
 0x14b   :  { %v454_v0 = vpop.eup %453 }
 0x14c   :  { %v274_v1 = vmul.f32 %v454_v0, %v272_v63  ;;  %v456_v39 = vpop.eup %455 }
 0x14d   :  { %v458_v40 = vpop.eup %457  ;;  %v180_v29 = vmul.f32 128.0, %v456_v39  ;;  %vm184_vm9 = vweird.f32 %v456_v39 }
 0x14e   :  { %v275_v2 = vmul.f32 %v454_v0, %v274_v1  ;;  %v460_v41 = vpop.eup %459  ;;  %v299_v42 = vmul.f32 512.0, %v458_v40  ;;  %vm303_vm10 = vweird.f32 %v458_v40  ;;  %v378_v1 = vstv %s407_s13 }
 0x14f   :  { %v366_v43 = vmul.f32 8.0, %v460_v41  ;;  %v181_v44 = vsub.f32 1.0, %v180_v29  ;;  %vm370_vm11 = vweird.f32 %v460_v41 }
 0x150   :  { %v276_v3 = vmul.f32 0.5, %v275_v2  ;;  %v300_v45 = vsub.f32 1.0, %v299_v42 }
 0x151   :  { %v367_v46 = vsub.f32 1.0, %v366_v43  ;;  %v182_v47 = vmul.f32 %v456_v39, %v181_v44 }
 0x152   :  { %v277_v4 = vsub.f32 1.5, %v276_v3  ;;  %v301_v48 = vmul.f32 %v458_v40, %v300_v45 }
 0x153   :  { %v368_v49 = vmul.f32 %v460_v41, %v367_v46  ;;  %v183_v50 = vadd.f32 %v456_v39, %v182_v47 }
 0x154   :  { %v278_v5 = vmul.f32 %v454_v0, %v277_v4  ;;  %v302_v52 = vadd.f32 %v458_v40, %v301_v48 }
 0x155   :  { %v369_v53 = vadd.f32 %v460_v41, %v368_v49  ;;  %v185_v55 = vsel %vm184_vm9, %v456_v39, %v183_v50 }
 0x156   :  { %v279_v6 = vmul.f32 %v278_v5, %v272_v63  ;;  %v304_v57 = vsel %vm303_vm10, %v458_v40, %v302_v52 }
 0x157   :  { %v371_v59 = vsel %vm370_vm11, %v460_v41, %v369_v53 }
 0x158   :  { %v281_v8 = vsel %vm280_vm7, %v272_v63, %v279_v6 }
 0x159   :  { %v284_v9 = vsel %vm282_vm8, %v283_v7, %v281_v8 }
 0x15a   :  { %v404_v10 = vadd.f32 -1.0, %v284_v9 }
 0x15c   :  { %v286_v11 = vand.u32 2147483647, %v404_v10 }
 0x15e   :  { %v287_v12 = vsel %vm167_vm5, %v286_v11, 0.0 }
 0x15f   :  { %288 = vadd.xlane.f32.xlu0 %v287_v12 }
 0x1ab   :  { %v170_v13 = vpop.xlane.xlu2 %169 }
 0x1ac   :  { %v171_v14 = vrot.slane %v170_v13, 4 }
 0x1ae   :  { %v172_v15 = vadd.f32 %v171_v14, %v170_v13 }
 0x1b0   :  { %v173_v16 = vrot.slane %v172_v15, 2 }
 0x1b2   :  { %v174_v17 = vadd.f32 %v173_v16, %v172_v15 }
 0x1b4   :  { %v175_v18 = vrot.slane %v174_v17, 1 }
 0x1b5   :  { %v356_v20 = vpop.xlane.xlu1 %355 }
 0x1b6   :  { %v176_v19 = vadd.f32 %v175_v18, %v174_v17  ;;  %v357_v21 = vrot.slane %v356_v20, 4 }
 0x1b8   :  { %410 = vpush %v176_v19  ;;  %v358_v22 = vadd.f32 %v357_v21, %v356_v20 }
 0x1ba   :  { %v359_v23 = vrot.slane %v358_v22, 2 }
 0x1bc   :  { %v360_v28 = vadd.f32 %v359_v23, %v358_v22 }
 0x1be   :  { %v361_v32 = vrot.slane %v360_v28, 1 }
 0x1c0   :  { %v362_v35 = vadd.f32 %v361_v32, %v360_v28 }
 0x1d2   :  { %v289_v24 = vpop.xlane.xlu0 %288 }
 0x1d3   :  { %v290_v25 = vrot.slane %v289_v24, 4 }
 0x1d5   :  { %v291_v27 = vadd.f32 %v290_v25, %v289_v24 }
 0x1d7   :  { %v292_v30 = vrot.slane %v291_v27, 2 }
 0x1d9   :  { %v293_v31 = vadd.f32 %v292_v30, %v291_v27 }
 0x1db   :  { %v294_v33 = vrot.slane %v293_v31, 1 }
 0x1dd   :  { %v295_v34 = vadd.f32 %v294_v33, %v293_v31 }
 0x1df   :  { %412 = vpush %v295_v34 }
 0x1e0   :  { %414 = vpush %v362_v35 }
 0x1e9   :  { %s411_s12 = spop %410 }
 0x1ea   :  { %v178_v54 = vstv %s411_s12 }
 0x1eb   :  { %v186_v26 = vmul.f32 %v185_v55, %v178_v54 }
 0x1ed   :  { %v374_v2 = vmul.f32 %v373_v58, %v186_v26  ;;  %v384_v3 = vsel %vm383_vm12, %v186_v26, 0.0 }
 0x210   :  { %s413_s14 = spop %412 }
 0x211   :  { %v297_v60 = vstv %s413_s14  ;;  %s415_s15 = spop %414 }
 0x212   :  { %v305_v62 = vmul.f32 %v304_v57, %v297_v60  ;;  %v364_v63 = vstv %s415_s15 }
 0x213   :  { %v372_v0 = vmul.f32 %v371_v59, %v364_v63 }
 0x214   :  { %v376_v4 = vmul.f32 %v375_v61, %v305_v62  ;;  %v386_v5 = vsel %vm385_vm13, %v305_v62, 0.0 }
 0x215   :  { %v387_v6 = vadd.f32 %v386_v5, %v384_v3  ;;  %v379_v8 = vmul.f32 %v378_v1, %v372_v0  ;;  %v389_v10 = vsel %vm388_vm14, %v372_v0, 0.0 }
 0x216   :  { %v377_v7 = vadd.f32 %v376_v4, %v374_v2 }
 0x217   :  { %v390_v11 = vadd.f32 %v389_v10, %v387_v6 }
 0x218   :  { %v380_v9 = vadd.f32 %v379_v8, %v377_v7 }
 0x21a   :  { %v392_v12 = vsel %vm391_vm15, %v380_v9, 0.0 }
 0x21b   :  { %v393_v13 = vadd.f32 %v392_v12, %v390_v11 }
 0x21d   :  { %394 = vst [vmem:[%s578_s5] sm:$0x1] %v393_v13 }
 0x21e   :  { %399 = vsyncpa [#allocation3], 1 }

</bundles_post_ra>
